<compile_context>
chip_gen: v6e
topology: v6e:2x2x1
jax: 0.10.0
libtpu: 0.0.40
codegen_flags: <defaults>
</compile_context>

<pallas_src>
import functools
import math

import jax
import jax.numpy as jnp
from jax.experimental import pallas as pl
from jax.experimental.pallas import tpu as pltpu


# --------------------------------------------------------------------------- #
# Kernel
# --------------------------------------------------------------------------- #
def _local_classifier_kernel(x_ref, w_ref, b_ref, o_ref, acc_ref, *, inv_hw, tc):
    # x_ref:   [TB, TC, HW]  streamed activation chunk (native NCHW; HW on lanes)
    # w_ref:   [C,  N_pad]   resident weight (fc.weight.T, zero-padded columns)
    # b_ref:   [1,  N_pad]   resident bias (f32, zero-padded)
    # o_ref:   [TB, N_pad]   lane-dense output block
    # acc_ref: [TB, N_pad]   f32 logit accumulator scratch
    c = pl.program_id(1)

    @pl.when(c == 0)
    def _init():
        acc_ref[...] = jnp.zeros_like(acc_ref)

    # f32 spatial mean for this channel chunk (sum over lanes, then scale).
    pooled = jnp.sum(x_ref[...].astype(jnp.float32), axis=-1) * inv_hw     # [TB, TC]

    # Contract the chunk against the matching rows of the resident weight.
    off = pl.multiple_of(c * tc, tc)
    w_chunk = w_ref[pl.ds(off, tc), :].astype(jnp.float32)                 # [TC, N_pad]
    acc_ref[...] += jnp.dot(pooled, w_chunk, preferred_element_type=jnp.float32)

    @pl.when(c == pl.num_programs(1) - 1)
    def _finalize():
        o_ref[...] = (acc_ref[...] + b_ref[...]).astype(o_ref.dtype)


# --------------------------------------------------------------------------- #
# Tiling / VMEM budgeting helpers
# --------------------------------------------------------------------------- #
def _ceil_to(x, m):
    return ((x + m - 1) // m) * m


def _pick_batch_tile(B):
    """Multiple-of-8 divisor of B (capped at 64), preferring >= 2 batch tiles so
    the 'parallel' batch axis can feed both TensorCores on v7x."""
    if B % 8 != 0 or B <= 8:
        # TODO(synk): for 1 < B <= 8 a sub-8 batch tile would allow 2 tiles for
        # v7x megacore, but sub-8 second-minor block dims are not portable
        # across generations, so we keep a single full-batch tile here.
        return B
    for t in (64, 32, 16, 8):
        if B % t == 0 and B // t >= 2:
            return t
    return 8


def _pick_channel_tile(C, per_channel_bytes, budget_bytes):
    """Largest multiple-of-8 divisor of C whose [TB, TC, HW] block fits the
    per-buffer budget; falls back to the smallest legal chunk, or to full C when
    C has no multiple-of-8 divisor (full-dim blocks are always legal)."""
    divisors = [d for d in range(8, C + 1, 8) if C % d == 0]
    if not divisors:
        return C
    fitting = [d for d in divisors if d * per_channel_bytes <= budget_bytes]
    return fitting[-1] if fitting else divisors[0]


def _vmem_capacity_bytes():
    try:
        cap = getattr(pltpu.get_tpu_info(), "vmem_capacity_bytes", None)
        if cap:
            return int(cap)
    except Exception:
        pass
    return 64 << 20  # conservative fallback: v7x per-core VMEM


def _default_x_block_budget_bytes(vmem_cap):
    kind = ""
    try:
        kind = jax.devices()[0].device_kind.lower()
    except Exception:
        pass
    if vmem_cap <= (64 << 20):
        return 8 << 20       # v7x: 64 MiB VMEM; 8 MiB blocks amortize grid-step cost
    if "v5" in kind:
        return 8 << 20       # v5e: ~820 GB/s; larger tiles buy <5%
    return 16 << 20          # v6e (128 MiB VMEM, ~1.4 TB/s)


# --------------------------------------------------------------------------- #
# pallas_call builder + wrapper
# --------------------------------------------------------------------------- #
def _make_pallas_call(*, B, C, HW, TB, TC, n_pad, out_dtype, inv_hw, vmem_limit,
                      cost, single_buffer_residents):
    resident_kwargs = {}
    if single_buffer_residents:
        # Weight/bias block index never changes: one VMEM buffer suffices, which
        # halves their footprint and frees room for larger x tiles (v7x).
        resident_kwargs = dict(pipeline_mode=pl.Buffered(1))

    grid = (B // TB, C // TC)
    return pl.pallas_call(
        functools.partial(_local_classifier_kernel, inv_hw=inv_hw, tc=TC),
        out_shape=jax.ShapeDtypeStruct((B, n_pad), out_dtype),
        grid_spec=pltpu.PrefetchScalarGridSpec(
            num_scalar_prefetch=0,
            grid=grid,
            in_specs=[
                pl.BlockSpec((TB, TC, HW), lambda i, c: (i, c, 0)),           # streamed
                pl.BlockSpec((C, n_pad), lambda i, c: (0, 0), **resident_kwargs),
                pl.BlockSpec((1, n_pad), lambda i, c: (0, 0), **resident_kwargs),
            ],
            out_specs=pl.BlockSpec((TB, n_pad), lambda i, c: (i, 0)),
            scratch_shapes=[pltpu.VMEM((TB, n_pad), jnp.float32)],
        ),
        compiler_params=pltpu.CompilerParams(
            dimension_semantics=("parallel", "arbitrary"),
            vmem_limit_bytes=vmem_limit,
        ),
        cost_estimate=cost,
    )


def local_classifier(x_nchw, weight, bias, *, x_block_budget_bytes=None):
    """AdaptiveAvgPool2d((1,1)) + flatten + Linear.

    x_nchw: [B, C, H, W] activations in native NCHW layout (no transpose done).
    weight: [num_classes, C] (PyTorch nn.Linear layout); bias: [num_classes].
    Returns [B, num_classes] in x_nchw.dtype.
    """
    B, C, H, W = x_nchw.shape
    num_classes = weight.shape[0]
    HW = H * W
    x_itemsize = jnp.dtype(x_nchw.dtype).itemsize
    w_itemsize = jnp.dtype(weight.dtype).itemsize

    # Free layout change: collapse the two contiguous spatial dims (no HBM copy).
    x3 = x_nchw.reshape(B, C, HW)

    # Lane-dense, zero-padded classifier dim; padded columns are exact zeros.
    n_pad = pl.cdiv(num_classes, 128) * 128
    w_t = jnp.zeros((C, n_pad), dtype=weight.dtype).at[:, :num_classes].set(weight.T)
    b2 = jnp.zeros((1, n_pad), dtype=jnp.float32).at[:, :num_classes].set(
        bias.astype(jnp.float32)[None, :])

    # ---- Tile selection & VMEM budgeting (per TPU generation). -------------
    vmem_cap = _vmem_capacity_bytes()
    cap_total = (48 << 20) if vmem_cap <= (64 << 20) else (96 << 20)
    if x_block_budget_bytes is None:
        x_block_budget_bytes = _default_x_block_budget_bytes(vmem_cap)

    TB = _pick_batch_tile(B)
    hw_lanes = _ceil_to(HW, 128)

    # Resident / non-streamed VMEM (weight & bias counted double-buffered in
    # case pipeline_mode=pl.Buffered(1) is unsupported on this jax/libtpu).
    w_bytes = _ceil_to(C, 8) * n_pad * w_itemsize
    b_bytes = 8 * n_pad * 4
    out_bytes = _ceil_to(TB, 8) * n_pad * x_itemsize
    acc_bytes = _ceil_to(TB, 8) * n_pad * 4
    fixed_bytes = 2 * w_bytes + 2 * b_bytes + 2 * out_bytes + acc_bytes

    avail_for_x = max(cap_total - fixed_bytes - (2 << 20), 1 << 20)
    budget = max(256 << 10, min(int(x_block_budget_bytes), avail_for_x // 2))

    TC = _pick_channel_tile(C, TB * hw_lanes * x_itemsize, budget)
    # If even the smallest legal channel chunk blows the budget, shed batch rows.
    while TB % 16 == 0 and TB * _ceil_to(TC, 8) * hw_lanes * x_itemsize > budget:
        TB //= 2
        TC = _pick_channel_tile(C, TB * hw_lanes * x_itemsize, budget)

    out_bytes = _ceil_to(TB, 8) * n_pad * x_itemsize
    acc_bytes = _ceil_to(TB, 8) * n_pad * 4
    x_block_bytes = TB * _ceil_to(TC, 8) * hw_lanes * x_itemsize
    vmem_need = (2 * x_block_bytes + 2 * w_bytes + 2 * b_bytes
                 + 2 * out_bytes + acc_bytes + (2 << 20))
    vmem_limit = int(min(max(vmem_need, 16 << 20), cap_total))
    vmem_limit = max(vmem_limit, int(vmem_need))   # never under-provision

    cost = pl.CostEstimate(
        flops=int(B * C * HW + 2 * B * C * n_pad),
        transcendentals=0,
        bytes_accessed=int(B * C * HW * x_itemsize + C * n_pad * w_itemsize
                           + n_pad * 4 + B * n_pad * x_itemsize),
    )

    kwargs = dict(B=B, C=C, HW=HW, TB=TB, TC=TC, n_pad=n_pad,
                  out_dtype=x_nchw.dtype, inv_hw=1.0 / float(HW),
                  vmem_limit=vmem_limit, cost=cost)
    try:
        out_padded = _make_pallas_call(single_buffer_residents=True, **kwargs)(x3, w_t, b2)
    except Exception:
        # pipeline_mode=pl.Buffered(1) unsupported on this jax/libtpu: fall back
        # to default double-buffered resident weight/bias (still correct).
        out_padded = _make_pallas_call(single_buffer_residents=False, **kwargs)(x3, w_t, b2)

    return out_padded[:, :num_classes]


# --------------------------------------------------------------------------- #
# Self-test
# --------------------------------------------------------------------------- #
if __name__ == "__main__":
    key = jax.random.PRNGKey(0)
    kx, kw, kb = jax.random.split(key, 3)

    # Small shapes consistent with the module's forward (in_features == C).
    B, C, H, W = 2, 4, 16, 16
    num_classes = 8

    x = jax.random.normal(kx, (B, C, H, W), dtype=jnp.float32)
    bound = 1.0 / math.sqrt(C)
    weight = jax.random.uniform(kw, (num_classes, C), jnp.float32, -bound, bound)
    bias = jax.random.uniform(kb, (num_classes,), jnp.float32, -bound, bound)

    ref = jnp.mean(x, axis=(2, 3)) @ weight.T + bias

    # 1) Default tiling (single channel chunk / single batch tile at this size).
    out = jax.block_until_ready(local_classifier(x, weight, bias))
    assert out.shape == (B, num_classes)
    assert jnp.allclose(out, ref, atol=1e-4, rtol=1e-4)

    # 2) bf16 activations (half the streamed HBM bytes; f32 accumulation kept).
    x_bf16 = x.astype(jnp.bfloat16)
    ref_bf16 = jnp.mean(x_bf16.astype(jnp.float32), axis=(2, 3)) @ weight.T + bias
    out_bf16 = jax.block_until_ready(local_classifier(x_bf16, weight, bias))
    assert out_bf16.dtype == jnp.bfloat16
    assert jnp.allclose(out_bf16.astype(jnp.float32), ref_bf16, atol=3e-2, rtol=3e-2)

    # 3) Config exercising multi-chunk channel accumulation and >=2 batch tiles
    #    (megacore path), with a deliberately tiny per-buffer block budget.
    B2, C2, H2, W2, NC2 = 16, 32, 8, 8, 10
    k1, k2, k3 = jax.random.split(jax.random.PRNGKey(1), 3)
    x2 = jax.random.normal(k1, (B2, C2, H2, W2), dtype=jnp.float32)
    bound2 = 1.0 / math.sqrt(C2)
    w2 = jax.random.uniform(k2, (NC2, C2), jnp.float32, -bound2, bound2)
    b2 = jax.random.uniform(k3, (NC2,), jnp.float32, -bound2, bound2)
    ref2 = jnp.mean(x2, axis=(2, 3)) @ w2.T + b2
    out2 = jax.block_until_ready(
        local_classifier(x2, w2, b2, x_block_budget_bytes=16 * 1024))
    assert jnp.allclose(out2, ref2, atol=1e-4, rtol=1e-4)

    print("KERNEL_OK")
</pallas_src>

<mosaic_0001>
module attributes {stable_mosaic.version = 11 : i64} {
  func.func @_local_classifier_kernel(%arg0: i32, %arg1: i32, %arg2: memref<2x4x256xf32, #tpu.memory_space<vmem>>, %arg3: memref<4x128xf32, #tpu.memory_space<vmem>>, %arg4: memref<1x128xf32, #tpu.memory_space<vmem>>, %arg5: memref<2x128xf32, #tpu.memory_space<vmem>>, %arg6: memref<2x128xf32, #tpu.memory_space<vmem>>) attributes {dimension_semantics = [#tpu.dimension_semantics<parallel>, #tpu.dimension_semantics<arbitrary>], iteration_bounds = array<i64: 1, 1>, scalar_prefetch = 0 : i64, scratch_operands = 1 : i64, tpu.core_type = #tpu.core_type<tc>, window_params = [{transform_indices = @transform_0, window_bounds = array<i64: 2, 4, 256>}, {pipeline_mode = #tpu.pipeline_mode<synchronous>, transform_indices = @transform_1, window_bounds = array<i64: 4, 128>}, {pipeline_mode = #tpu.pipeline_mode<synchronous>, transform_indices = @transform_2, window_bounds = array<i64: 1, 128>}, {transform_indices = @transform_3, window_bounds = array<i64: 2, 128>}]} {
    %c0_i32 = arith.constant 0 : i32
    %0 = arith.cmpi eq, %arg1, %c0_i32 : i32
    %1 = arith.extui %0 : i1 to i32
    %c0_i32_0 = arith.constant 0 : i32
    %2 = arith.cmpi ne, %1, %c0_i32_0 : i32
    scf.if %2 {
      %cst_12 = arith.constant 0.000000e+00 : f32
      %18 = vector.broadcast %cst_12 : f32 to vector<2x128xf32>
      %c0_13 = arith.constant 0 : index
      %c0_14 = arith.constant 0 : index
      %19 = vector.load %arg6[%c0_13, %c0_14] : memref<2x128xf32, #tpu.memory_space<vmem>>, vector<2x128xf32>
      tpu.vector_store %arg6[%c0_13, %c0_14], %18 {strides = array<i32>} : memref<2x128xf32, #tpu.memory_space<vmem>>, vector<2x128xf32>,
    } else {
    }
    %c0 = arith.constant 0 : index
    %c0_1 = arith.constant 0 : index
    %c0_2 = arith.constant 0 : index
    %3 = vector.load %arg2[%c0, %c0_1, %c0_2] : memref<2x4x256xf32, #tpu.memory_space<vmem>>, vector<2x4x256xf32>
    %cst = arith.constant dense<0.000000e+00> : vector<2x4xf32>
    %4 = vector.multi_reduction <add>, %3, %cst [2] : vector<2x4x256xf32> to vector<2x4xf32>
    %cst_3 = arith.constant 3.906250e-03 : f32
    %5 = vector.broadcast %cst_3 : f32 to vector<2x4xf32>
    %6 = arith.mulf %4, %5 : vector<2x4xf32>
    %c4_i32 = arith.constant 4 : i32
    %7 = arith.muli %arg1, %c4_i32 : i32
    %8 = tpu.assume_multiple %7, 4 : i32
    %9 = arith.index_cast %8 : i32 to index
    %c0_4 = arith.constant 0 : index
    %10 = vector.load %arg3[%9, %c0_4] : memref<4x128xf32, #tpu.memory_space<vmem>>, vector<4x128xf32>
    %c0_5 = arith.constant 0 : index
    %c0_6 = arith.constant 0 : index
    %11 = vector.load %arg6[%c0_5, %c0_6] : memref<2x128xf32, #tpu.memory_space<vmem>>, vector<2x128xf32>
    %cst_7 = arith.constant dense<0.000000e+00> : vector<2x128xf32>
    %12 = tpu.matmul %6, %10, %cst_7 {dimension_numbers = #tpu.dot_dimension_numbers<[1], [0], [0], [1], [0, 0, 1, 1], [], []>} : vector<2x4xf32>, vector<4x128xf32>, vector<2x128xf32> -> vector<2x128xf32>
    %13 = arith.addf %11, %12 : vector<2x128xf32>
    %c0_8 = arith.constant 0 : index
    %c0_9 = arith.constant 0 : index
    %14 = vector.load %arg6[%c0_8, %c0_9] : memref<2x128xf32, #tpu.memory_space<vmem>>, vector<2x128xf32>
    tpu.vector_store %arg6[%c0_8, %c0_9], %13 {strides = array<i32>} : memref<2x128xf32, #tpu.memory_space<vmem>>, vector<2x128xf32>,
    %c0_i32_10 = arith.constant 0 : i32
    %15 = arith.cmpi eq, %arg1, %c0_i32_10 : i32
    %16 = arith.extui %15 : i1 to i32
    %c0_i32_11 = arith.constant 0 : i32
    %17 = arith.cmpi ne, %16, %c0_i32_11 : i32
    scf.if %17 {
      %c0_12 = arith.constant 0 : index
      %c0_13 = arith.constant 0 : index
      %18 = vector.load %arg6[%c0_12, %c0_13] : memref<2x128xf32, #tpu.memory_space<vmem>>, vector<2x128xf32>
      %c0_14 = arith.constant 0 : index
      %c0_15 = arith.constant 0 : index
      %19 = vector.load %arg4[%c0_14, %c0_15] : memref<1x128xf32, #tpu.memory_space<vmem>>, vector<1x128xf32>
      %20 = vector.broadcast %19 : vector<1x128xf32> to vector<2x128xf32>
      %21 = arith.addf %18, %20 : vector<2x128xf32>
      %c0_16 = arith.constant 0 : index
      %c0_17 = arith.constant 0 : index
      %22 = vector.load %arg5[%c0_16, %c0_17] : memref<2x128xf32, #tpu.memory_space<vmem>>, vector<2x128xf32>
      tpu.vector_store %arg5[%c0_16, %c0_17], %21 {strides = array<i32>} : memref<2x128xf32, #tpu.memory_space<vmem>>, vector<2x128xf32>,
    } else {
    }
    return
  }
  func.func @transform_0(%arg0: i32, %arg1: i32) -> (i32, i32, i32) {
    %c0_i32 = arith.constant 0 : i32
    %c0_i32_0 = arith.constant 0 : i32
    return %arg0, %arg1, %c0_i32 : i32, i32, i32
  }
  func.func @transform_1(%arg0: i32, %arg1: i32) -> (i32, i32) {
    %c0_i32 = arith.constant 0 : i32
    %c0_i32_0 = arith.constant 0 : i32
    %c0_i32_1 = arith.constant 0 : i32
    return %c0_i32, %c0_i32_0 : i32, i32
  }
  func.func @transform_2(%arg0: i32, %arg1: i32) -> (i32, i32) {
    %c0_i32 = arith.constant 0 : i32
    %c0_i32_0 = arith.constant 0 : i32
    %c0_i32_1 = arith.constant 0 : i32
    return %c0_i32, %c0_i32_0 : i32, i32
  }
  func.func @transform_3(%arg0: i32, %arg1: i32) -> (i32, i32) {
    %c0_i32 = arith.constant 0 : i32
    %c0_i32_0 = arith.constant 0 : i32
    return %arg0, %c0_i32 : i32, i32
  }
}

module attributes {stable_mosaic.version = 11 : i64} {
  func.func @_local_classifier_kernel(%arg0: i32, %arg1: i32, %arg2: memref<2x4x256xf32, #tpu.memory_space<vmem>>, %arg3: memref<4x128xf32, #tpu.memory_space<vmem>>, %arg4: memref<1x128xf32, #tpu.memory_space<vmem>>, %arg5: memref<2x128xf32, #tpu.memory_space<vmem>>, %arg6: memref<2x128xf32, #tpu.memory_space<vmem>>) attributes {dimension_semantics = [#tpu.dimension_semantics<parallel>, #tpu.dimension_semantics<arbitrary>], iteration_bounds = array<i64: 1, 1>, scalar_prefetch = 0 : i64, scratch_operands = 1 : i64, tpu.core_type = #tpu.core_type<tc>, window_params = [{transform_indices = @transform_0, window_bounds = array<i64: 2, 4, 256>}, {pipeline_mode = #tpu.pipeline_mode<synchronous>, transform_indices = @transform_1, window_bounds = array<i64: 4, 128>}, {pipeline_mode = #tpu.pipeline_mode<synchronous>, transform_indices = @transform_2, window_bounds = array<i64: 1, 128>}, {transform_indices = @transform_3, window_bounds = array<i64: 2, 128>}]} {
    %c0_i32 = arith.constant 0 : i32
    %0 = arith.cmpi eq, %arg1, %c0_i32 : i32
    %1 = arith.extui %0 : i1 to i32
    %c0_i32_0 = arith.constant 0 : i32
    %2 = arith.cmpi ne, %1, %c0_i32_0 : i32
    scf.if %2 {
      %cst_12 = arith.constant 0.000000e+00 : f32
      %18 = vector.broadcast %cst_12 : f32 to vector<2x128xf32>
      %c0_13 = arith.constant 0 : index
      %c0_14 = arith.constant 0 : index
      %19 = vector.load %arg6[%c0_13, %c0_14] : memref<2x128xf32, #tpu.memory_space<vmem>>, vector<2x128xf32>
      tpu.vector_store %arg6[%c0_13, %c0_14], %18 {strides = array<i32>} : memref<2x128xf32, #tpu.memory_space<vmem>>, vector<2x128xf32>,
    } else {
    }
    %c0 = arith.constant 0 : index
    %c0_1 = arith.constant 0 : index
    %c0_2 = arith.constant 0 : index
    %3 = vector.load %arg2[%c0, %c0_1, %c0_2] : memref<2x4x256xf32, #tpu.memory_space<vmem>>, vector<2x4x256xf32>
    %cst = arith.constant dense<0.000000e+00> : vector<2x4xf32>
    %4 = vector.multi_reduction <add>, %3, %cst [2] : vector<2x4x256xf32> to vector<2x4xf32>
    %cst_3 = arith.constant 3.906250e-03 : f32
    %5 = vector.broadcast %cst_3 : f32 to vector<2x4xf32>
    %6 = arith.mulf %4, %5 : vector<2x4xf32>
    %c4_i32 = arith.constant 4 : i32
    %7 = arith.muli %arg1, %c4_i32 : i32
    %8 = tpu.assume_multiple %7, 4 : i32
    %9 = arith.index_cast %8 : i32 to index
    %c0_4 = arith.constant 0 : index
    %10 = vector.load %arg3[%9, %c0_4] : memref<4x128xf32, #tpu.memory_space<vmem>>, vector<4x128xf32>
    %c0_5 = arith.constant 0 : index
    %c0_6 = arith.constant 0 : index
    %11 = vector.load %arg6[%c0_5, %c0_6] : memref<2x128xf32, #tpu.memory_space<vmem>>, vector<2x128xf32>
    %cst_7 = arith.constant dense<0.000000e+00> : vector<2x128xf32>
    %12 = tpu.matmul %6, %10, %cst_7 {dimension_numbers = #tpu.dot_dimension_numbers<[1], [0], [0], [1], [0, 0, 1, 1], [], []>} : vector<2x4xf32>, vector<4x128xf32>, vector<2x128xf32> -> vector<2x128xf32>
    %13 = arith.addf %11, %12 : vector<2x128xf32>
    %c0_8 = arith.constant 0 : index
    %c0_9 = arith.constant 0 : index
    %14 = vector.load %arg6[%c0_8, %c0_9] : memref<2x128xf32, #tpu.memory_space<vmem>>, vector<2x128xf32>
    tpu.vector_store %arg6[%c0_8, %c0_9], %13 {strides = array<i32>} : memref<2x128xf32, #tpu.memory_space<vmem>>, vector<2x128xf32>,
    %c0_i32_10 = arith.constant 0 : i32
    %15 = arith.cmpi eq, %arg1, %c0_i32_10 : i32
    %16 = arith.extui %15 : i1 to i32
    %c0_i32_11 = arith.constant 0 : i32
    %17 = arith.cmpi ne, %16, %c0_i32_11 : i32
    scf.if %17 {
      %c0_12 = arith.constant 0 : index
      %c0_13 = arith.constant 0 : index
      %18 = vector.load %arg6[%c0_12, %c0_13] : memref<2x128xf32, #tpu.memory_space<vmem>>, vector<2x128xf32>
      %c0_14 = arith.constant 0 : index
      %c0_15 = arith.constant 0 : index
      %19 = vector.load %arg4[%c0_14, %c0_15] : memref<1x128xf32, #tpu.memory_space<vmem>>, vector<1x128xf32>
      %20 = vector.broadcast %19 : vector<1x128xf32> to vector<2x128xf32>
      %21 = arith.addf %18, %20 : vector<2x128xf32>
      %c0_16 = arith.constant 0 : index
      %c0_17 = arith.constant 0 : index
      %22 = vector.load %arg5[%c0_16, %c0_17] : memref<2x128xf32, #tpu.memory_space<vmem>>, vector<2x128xf32>
      tpu.vector_store %arg5[%c0_16, %c0_17], %21 {strides = array<i32>} : memref<2x128xf32, #tpu.memory_space<vmem>>, vector<2x128xf32>,
    } else {
    }
    return
  }
  func.func @transform_0(%arg0: i32, %arg1: i32) -> (i32, i32, i32) {
    %c0_i32 = arith.constant 0 : i32
    %c0_i32_0 = arith.constant 0 : i32
    return %arg0, %arg1, %c0_i32 : i32, i32, i32
  }
  func.func @transform_1(%arg0: i32, %arg1: i32) -> (i32, i32) {
    %c0_i32 = arith.constant 0 : i32
    %c0_i32_0 = arith.constant 0 : i32
    %c0_i32_1 = arith.constant 0 : i32
    return %c0_i32, %c0_i32_0 : i32, i32
  }
  func.func @transform_2(%arg0: i32, %arg1: i32) -> (i32, i32) {
    %c0_i32 = arith.constant 0 : i32
    %c0_i32_0 = arith.constant 0 : i32
    %c0_i32_1 = arith.constant 0 : i32
    return %c0_i32, %c0_i32_0 : i32, i32
  }
  func.func @transform_3(%arg0: i32, %arg1: i32) -> (i32, i32) {
    %c0_i32 = arith.constant 0 : i32
    %c0_i32_0 = arith.constant 0 : i32
    return %arg0, %c0_i32 : i32, i32
  }
}

</mosaic_0001>

<bundles_post_ra>
// kernel: tpu_custom_call.1
= control target key start
LH: loop header
LB: loop body
LE: loop exit
PB: predicated region body
PF: predicated region fallthrough
CT: control target
= control target key end

     0   :  { %8 = vsyncpa [#allocation4], 0  ;;  %s321_s0 = inlined_call_operand.hbm [shape: f32[2,4,256], index: 0, kind: input, shape index: {}]   ;;  %s322_s1 = inlined_call_operand.hbm [shape: f32[4,128], index: 1, kind: input, shape index: {}]   ;;  %s323_s2 = inlined_call_operand.vmem [shape: f32[1,128], index: 2, kind: input, shape index: {}]   ;;  %s324_s3 = inlined_call_operand.hbm [shape: f32[2,128], index: 3, kind: output, shape index: {}]  }
   0x1   :  { %9 = vsyncpa [#allocation7], 0 }
   0x2   :  { %10 = vsyncpa [#allocation5], 0  ;;  %s277_s12 = smov [#allocation3]  }
   0x3   :  { %s16_s13 = sshll.u32 %s277_s12, 4  ;;  %s17_s13 = int_to_ptr.vmem [resolvable:$true] %s16_s13 }
   0x4   :  { %s219_s14 = scalar_lea.vmem %s17_s13, 256  ;;  %p224_p1 = scmp.lt.s32.totalorder %s17_s13, %s17_s13 }
   0x5   :  { %p220_p0 = scmp.ne.s32.totalorder %s17_s13, %s219_s14  ;;  %p225_p2 = scmp.lt.s32.totalorder %s219_s14, %s219_s14 }
   0x7   :  { %p226_p3 = por %p225_p2, %p224_p1 }
   0x9   :  { %p227_p4 = pnand %p226_p3, %p220_p0 }
   0xb   :  { %230 = shalt.err (!%p227_p4)
}
   0xc   :  { %s278_s15 = smov 128   ;;  %s279_s16 = smov 8  }
   0xd   :  { %22 = dma.hbm_to_vmem [thread:$0]  %s321_s0, 256, %s17_s13, [#allocation4], %s278_s15, %s278_s15, %s279_s16  }
   0xe   :  { %s280_s19 = smov [#allocation6]  }
   0xf   :  { %s29_s20 = sshll.u32 %s280_s19, 4  ;;  %s30_s20 = int_to_ptr.vmem [resolvable:$true] %s29_s20 }
  0x10   :  { %s239_s21 = scalar_lea.vmem %s30_s20, 64  ;;  %p244_p6 = scmp.lt.s32.totalorder %s30_s20, %s30_s20 }
  0x11   :  { %p240_p5 = scmp.ne.s32.totalorder %s30_s20, %s239_s21  ;;  %p245_p7 = scmp.lt.s32.totalorder %s239_s21, %s239_s21 }
  0x13   :  { %p246_p8 = por %p245_p7, %p244_p6 }
  0x15   :  { %p247_p9 = pnand %p246_p8, %p240_p5 }
  0x17   :  { %250 = shalt.err (!%p247_p9)
}
  0x18   :  { %32 = dma.hbm_to_vmem [thread:$0]  %s322_s1, 64, %s30_s20, [#allocation7]  }
  0x19   :  { %271 = dma.done.wait [#allocation4], 256  }
  0x1a   :  { %272 = vsyncadd [#allocation4], 4294967040 }
  0x1b   :  { %273 = dma.done.wait [#allocation7], 64  }
  0x1c   :  { %274 = vsyncadd [#allocation7], 4294967232  ;;  %vm54_vm0 = vcmask 1043456   ;;  %v46_v0 = vld [vmem:[#allocation3] sm:$0xff]  ;;  %v47_v1 = vld [vmem:[#allocation3 + $0x8] sm:$0xff]  ;;  %v281_v11 = vmov 0.0   ;;  %v73_v12 = vlaneseq }
  0x1d   :  { %v50_v2 = vcombine.high %v46_v0, %v46_v0  ;;  %v55_v3 = vsel %vm54_vm0, %v46_v0, 0.0  ;;  %v51_v4 = vcombine.high %v47_v1, %v47_v1  ;;  %v60_v6 = vsel %vm54_vm0, %v47_v1, 0.0  ;;  %v69_v10 = vld [vmem:[#allocation6] sm:$0xf]  ;;  %45 = vst [vmem:[#allocation2] sm:$0x3] %v281_v11  ;;  %197 = vmatprep.subr.mxu0 %v281_v11 }
  0x1e   :  { %vm282_vm1 = vmmov 0   ;;  %198 = vmatpush3.msk.msra.mxu0 %vm54_vm0, %v69_v10  ;;  %v74_v13 = vand.u32 127, %v73_v12  ;;  %v76_v14 = vshrl.u32 %v73_v12, 7  ;;  %vm83_vm2 = vcmask 1041409   ;;  %v194_v27 = vld [vmem:[%s323_s2] ss:$0 sm:$0xff] }
  0x1f   :  { %v56_v5 = vsel %vm54_vm0, %v50_v2, 0.0  ;;  %v61_v7 = vsel %vm54_vm0, %v51_v4, 0.0  ;;  %199 = vmatprep.mubr.msk.f32.mxu0 %vm282_vm1, %v281_v11  ;;  %vm85_vm3 = vcmask 31744   ;;  %s283_s24 = smov [#allocation8]  }
  0x20   :  { %v57_v8 = vadd.f32 %v56_v5, %v55_v3  ;;  %v62_v9 = vadd.f32 %v61_v7, %v60_v6  ;;  %v77_v16 = vsub.s32 %v74_v13, %v76_v14  ;;  %s182_s25 = sshll.u32 %s283_s24, 4  ;;  %s183_s25 = int_to_ptr.vmem [resolvable:$true] %s182_s25 }
  0x21   :  { %s251_s26 = scalar_lea.vmem %s183_s25, 32  ;;  %p256_p11 = scmp.lt.s32.totalorder %s183_s25, %s183_s25 }
  0x22   :  { %58 = vadd.xlane.f32.xlu0 %v57_v8  ;;  %p252_p10 = scmp.ne.s32.totalorder %s183_s25, %s251_s26  ;;  %p257_p12 = scmp.lt.s32.totalorder %s251_s26, %s251_s26 }
  0x24   :  { %v70_v23 = vld [vmem:[#allocation2] sm:$0x3]  ;;  %p258_p13 = por %p257_p12, %p256_p11 }
  0x26   :  { %63 = vadd.xlane.f32.xlu0 %v62_v9  ;;  %p259_p0 = pnand %p258_p13, %p252_p10 }
  0xab   :  { %v59_v15 = vpop.xlane.xlu0 %58 }
  0xac   :  { %v65_v17 = vmul.f32 0.00390625, %v59_v15 }
  0xae   :  { %v78_v20 = vrot.slane %v65_v17, %v77_v16 }
  0xaf   :  { %v64_v18 = vpop.xlane.xlu0 %63 }
  0xb0   :  { %v66_v19 = vmul.f32 0.00390625, %v64_v18 }
  0xb2   :  { %v82_v21 = vrot.slane %v66_v19, %v77_v16 }
  0xb4   :  { %v84_v22 = vsel %vm83_vm2, %v82_v21, %v78_v20 }
  0xb5   :  { %200 = vmatmul.mubr.msk.f32.vlgmr.msra.gmra.mxu0 %vm85_vm3, %v84_v22 }
 0x175   :  { %v157_v24 = vpop.f32.mrf.mxu0 }
 0x176   :  { %v161_v25 = vadd.f32 %v157_v24, %v70_v23 }
 0x177   :  { %v201_v26 = vpop.f32.mrf.mxu0 }
 0x178   :  { %162 = vst [vmem:[#allocation2] sm:$0x3] %v161_v25 }
 0x17f   :  { %v166_v28 = vld [vmem:[#allocation2] sm:$0x3] }
 0x180   :  { %v174_v29 = vadd.f32 %v194_v27, %v166_v28 }
 0x182   :  { %175 = vst [vmem:[#allocation8] sm:$0x3] %v174_v29 }
 0x183   :  { %262 = shalt.err (!%p259_p0)
}
 0x184   :  { %185 = dma.vmem_to_hbm [thread:$0]  %s183_s25, 32, %s324_s3, [#allocation5]  }
 0x185   :  { %275 = dma.done.wait [#allocation5], 32  }
 0x186   :  { %276 = vsyncadd [#allocation5], 4294967264 }
 0x187   :  { %189 = vsyncpa [#allocation4], 1 }
 0x188   :  { %190 = vsyncpa [#allocation7], 1 }
 0x189   :  { %191 = vsyncpa [#allocation5], 1 }

// kernel: tpu_custom_call.1
= control target key start
LH: loop header
LB: loop body
LE: loop exit
PB: predicated region body
PF: predicated region fallthrough
CT: control target
= control target key end

     0   :  { %8 = vsyncpa [#allocation4], 0  ;;  %s321_s0 = inlined_call_operand.hbm [shape: f32[2,4,256], index: 0, kind: input, shape index: {}]   ;;  %s322_s1 = inlined_call_operand.hbm [shape: f32[4,128], index: 1, kind: input, shape index: {}]   ;;  %s323_s2 = inlined_call_operand.vmem [shape: f32[1,128], index: 2, kind: input, shape index: {}]   ;;  %s324_s3 = inlined_call_operand.hbm [shape: f32[2,128], index: 3, kind: output, shape index: {}]  }
   0x1   :  { %9 = vsyncpa [#allocation7], 0 }
   0x2   :  { %10 = vsyncpa [#allocation5], 0  ;;  %s277_s12 = smov [#allocation3]  }
   0x3   :  { %s16_s13 = sshll.u32 %s277_s12, 4  ;;  %s17_s13 = int_to_ptr.vmem [resolvable:$true] %s16_s13 }
   0x4   :  { %s219_s14 = scalar_lea.vmem %s17_s13, 256  ;;  %p224_p1 = scmp.lt.s32.totalorder %s17_s13, %s17_s13 }
   0x5   :  { %p220_p0 = scmp.ne.s32.totalorder %s17_s13, %s219_s14  ;;  %p225_p2 = scmp.lt.s32.totalorder %s219_s14, %s219_s14 }
   0x7   :  { %p226_p3 = por %p225_p2, %p224_p1 }
   0x9   :  { %p227_p4 = pnand %p226_p3, %p220_p0 }
   0xb   :  { %230 = shalt.err (!%p227_p4)
}
   0xc   :  { %s278_s15 = smov 128   ;;  %s279_s16 = smov 8  }
   0xd   :  { %22 = dma.hbm_to_vmem [thread:$0]  %s321_s0, 256, %s17_s13, [#allocation4], %s278_s15, %s278_s15, %s279_s16  }
   0xe   :  { %s280_s19 = smov [#allocation6]  }
   0xf   :  { %s29_s20 = sshll.u32 %s280_s19, 4  ;;  %s30_s20 = int_to_ptr.vmem [resolvable:$true] %s29_s20 }
  0x10   :  { %s239_s21 = scalar_lea.vmem %s30_s20, 64  ;;  %p244_p6 = scmp.lt.s32.totalorder %s30_s20, %s30_s20 }
  0x11   :  { %p240_p5 = scmp.ne.s32.totalorder %s30_s20, %s239_s21  ;;  %p245_p7 = scmp.lt.s32.totalorder %s239_s21, %s239_s21 }
  0x13   :  { %p246_p8 = por %p245_p7, %p244_p6 }
  0x15   :  { %p247_p9 = pnand %p246_p8, %p240_p5 }
  0x17   :  { %250 = shalt.err (!%p247_p9)
}
  0x18   :  { %32 = dma.hbm_to_vmem [thread:$0]  %s322_s1, 64, %s30_s20, [#allocation7]  }
  0x19   :  { %271 = dma.done.wait [#allocation4], 256  }
  0x1a   :  { %272 = vsyncadd [#allocation4], 4294967040 }
  0x1b   :  { %273 = dma.done.wait [#allocation7], 64  }
  0x1c   :  { %274 = vsyncadd [#allocation7], 4294967232  ;;  %vm54_vm0 = vcmask 1043456   ;;  %v46_v0 = vld [vmem:[#allocation3] sm:$0xff]  ;;  %v47_v1 = vld [vmem:[#allocation3 + $0x8] sm:$0xff]  ;;  %v281_v11 = vmov 0.0   ;;  %v73_v12 = vlaneseq }
  0x1d   :  { %v50_v2 = vcombine.high %v46_v0, %v46_v0  ;;  %v55_v3 = vsel %vm54_vm0, %v46_v0, 0.0  ;;  %v51_v4 = vcombine.high %v47_v1, %v47_v1  ;;  %v60_v6 = vsel %vm54_vm0, %v47_v1, 0.0  ;;  %v69_v10 = vld [vmem:[#allocation6] sm:$0xf]  ;;  %45 = vst [vmem:[#allocation2] sm:$0x3] %v281_v11  ;;  %197 = vmatprep.subr.mxu0 %v281_v11 }
  0x1e   :  { %vm282_vm1 = vmmov 0   ;;  %198 = vmatpush3.msk.msra.mxu0 %vm54_vm0, %v69_v10  ;;  %v74_v13 = vand.u32 127, %v73_v12  ;;  %v76_v14 = vshrl.u32 %v73_v12, 7  ;;  %vm83_vm2 = vcmask 1041409   ;;  %v194_v27 = vld [vmem:[%s323_s2] ss:$0 sm:$0xff] }
  0x1f   :  { %v56_v5 = vsel %vm54_vm0, %v50_v2, 0.0  ;;  %v61_v7 = vsel %vm54_vm0, %v51_v4, 0.0  ;;  %199 = vmatprep.mubr.msk.f32.mxu0 %vm282_vm1, %v281_v11  ;;  %vm85_vm3 = vcmask 31744   ;;  %s283_s24 = smov [#allocation8]  }
  0x20   :  { %v57_v8 = vadd.f32 %v56_v5, %v55_v3  ;;  %v62_v9 = vadd.f32 %v61_v7, %v60_v6  ;;  %v77_v16 = vsub.s32 %v74_v13, %v76_v14  ;;  %s182_s25 = sshll.u32 %s283_s24, 4  ;;  %s183_s25 = int_to_ptr.vmem [resolvable:$true] %s182_s25 }
  0x21   :  { %s251_s26 = scalar_lea.vmem %s183_s25, 32  ;;  %p256_p11 = scmp.lt.s32.totalorder %s183_s25, %s183_s25 }
  0x22   :  { %58 = vadd.xlane.f32.xlu0 %v57_v8  ;;  %p252_p10 = scmp.ne.s32.totalorder %s183_s25, %s251_s26  ;;  %p257_p12 = scmp.lt.s32.totalorder %s251_s26, %s251_s26 }
  0x24   :  { %v70_v23 = vld [vmem:[#allocation2] sm:$0x3]  ;;  %p258_p13 = por %p257_p12, %p256_p11 }
  0x26   :  { %63 = vadd.xlane.f32.xlu0 %v62_v9  ;;  %p259_p0 = pnand %p258_p13, %p252_p10 }
  0xab   :  { %v59_v15 = vpop.xlane.xlu0 %58 }
  0xac   :  { %v65_v17 = vmul.f32 0.00390625, %v59_v15 }
  0xae   :  { %v78_v20 = vrot.slane %v65_v17, %v77_v16 }
  0xaf   :  { %v64_v18 = vpop.xlane.xlu0 %63 }
  0xb0   :  { %v66_v19 = vmul.f32 0.00390625, %v64_v18 }
  0xb2   :  { %v82_v21 = vrot.slane %v66_v19, %v77_v16 }
  0xb4   :  { %v84_v22 = vsel %vm83_vm2, %v82_v21, %v78_v20 }
  0xb5   :  { %200 = vmatmul.mubr.msk.f32.vlgmr.msra.gmra.mxu0 %vm85_vm3, %v84_v22 }
 0x175   :  { %v157_v24 = vpop.f32.mrf.mxu0 }
 0x176   :  { %v161_v25 = vadd.f32 %v157_v24, %v70_v23 }
 0x177   :  { %v201_v26 = vpop.f32.mrf.mxu0 }
 0x178   :  { %162 = vst [vmem:[#allocation2] sm:$0x3] %v161_v25 }
 0x17f   :  { %v166_v28 = vld [vmem:[#allocation2] sm:$0x3] }
 0x180   :  { %v174_v29 = vadd.f32 %v194_v27, %v166_v28 }
 0x182   :  { %175 = vst [vmem:[#allocation8] sm:$0x3] %v174_v29 }
 0x183   :  { %262 = shalt.err (!%p259_p0)
}
 0x184   :  { %185 = dma.vmem_to_hbm [thread:$0]  %s183_s25, 32, %s324_s3, [#allocation5]  }
 0x185   :  { %275 = dma.done.wait [#allocation5], 32  }
 0x186   :  { %276 = vsyncadd [#allocation5], 4294967264 }
 0x187   :  { %189 = vsyncpa [#allocation4], 1 }
 0x188   :  { %190 = vsyncpa [#allocation7], 1 }
 0x189   :  { %191 = vsyncpa [#allocation5], 1 }

</bundles_post_ra>
